<compile_context>
chip_gen: v6e
topology: v6e:2x2x1
jax: 0.10.0
libtpu: 0.0.40
codegen_flags: <defaults>
</compile_context>

<pallas_src>
import jax
import jax.numpy as jnp
from jax.experimental import pallas as pl
from jax.experimental.pallas import tpu as pltpu  # noqa: F401  (TPU backend)

D_MODEL = 32
N_HEADS = 8
HEAD_DIM = D_MODEL // N_HEADS
D_FF = 64
LN_EPS = 1e-5
VEC_LANES = 128


def _layernorm(x, gamma, beta):
    mu = jnp.mean(x, axis=-1, keepdims=True)
    var = jnp.mean((x - mu) ** 2, axis=-1, keepdims=True)
    return (x - mu) * jax.lax.rsqrt(var + LN_EPS) * gamma + beta


# --------------------------------------------------------------------------- #
# Kernel
# --------------------------------------------------------------------------- #
def encoder_layer_kernel(x_ref, w_ref, w2_ref, vec_ref, out_ref):
    B, N, C = x_ref.shape
    H, HD, F = N_HEADS, HEAD_DIM, D_FF
    BN = B * N
    C3 = 3 * C

    x = x_ref[...].reshape(BN, C)            # leading-dim merge: layout no-op

    # ---- unpack the parameter slabs (static slices, one DMA per slab) -------
    w = w_ref[...]                           # (C, 3C + C + F)
    wqkv = w[:, 0:C3]                        # fused [Wq | Wk | Wv]
    wp = w[:, C3:C3 + C]                     # attention proj
    w1 = w[:, C3 + C:C3 + C + F]             # fc1 (starts on a 128-lane tile)
    w2 = w2_ref[...]                         # (F, C) fc2

    vec = vec_ref[...]                       # (rows, 128)
    qkv_add = vec[0:BN, 0:C3]                # q/k/v bias + pe@Wq / pe@Wk folded
    bmask = vec[0:BN, C3:C3 + BN]            # 0 within batch, -1e30 across
    hmask = vec[BN:BN + H, 0:C]              # (H, C) head lane mask
    rb, rl = BN + H, BN + H + 1
    pb = vec[rb:rb + 1, 0:C]
    b1 = vec[rb:rb + 1, C:C + F]
    b2 = vec[rb:rb + 1, C + F:2 * C + F]
    g1 = vec[rl:rl + 1, 0:C]
    be1 = vec[rl:rl + 1, C:2 * C]
    g2 = vec[rl:rl + 1, 2 * C:3 * C]
    be2 = vec[rl:rl + 1, 3 * C:4 * C]

    # ---- fused QKV projection; PE already folded into qkv_add ---------------
    qkv = jnp.dot(x, wqkv, preferred_element_type=jnp.float32) + qkv_add
    q = qkv[:, 0:C]
    k = qkv[:, C:2 * C]
    v = qkv[:, 2 * C:C3]

    # ---- multi-head attention: head lane-mask + two flat M=H*BN matmuls -----
    hm = hmask[:, None, :]                                   # (H, 1, C)
    qh = (q[None, :, :] * hm).reshape(H * BN, C)             # head-h lanes only
    s = pl.dot(qh, k, trans_b=True)                          # (H*BN, BN) = qh @ k^T
    s = s.reshape(H, BN, BN) * (HD ** -0.5) + bmask[None, :, :]
    s = s - jnp.max(s, axis=-1, keepdims=True)
    e = jnp.exp(s)
    att = e / jnp.sum(e, axis=-1, keepdims=True)             # exact softmax

    ctx = jnp.dot(att.reshape(H * BN, BN), v,
                  preferred_element_type=jnp.float32)        # (H*BN, C)
    att_out = jnp.sum(ctx.reshape(H, BN, C) * hm, axis=0)    # heads -> disjoint lanes

    attn = jnp.dot(att_out, wp, preferred_element_type=jnp.float32) + pb

    # ---- residual + norm1, MLP (fc1 -> ReLU -> fc2), residual + norm2 -------
    y = _layernorm(x + attn, g1, be1)
    h = jnp.maximum(jnp.dot(y, w1, preferred_element_type=jnp.float32) + b1, 0.0)
    m = jnp.dot(h, w2, preferred_element_type=jnp.float32) + b2
    out = _layernorm(y + m, g2, be2)

    out_ref[...] = out.reshape(B, N, C)      # leading-dim split: layout no-op


# --------------------------------------------------------------------------- #
# Host-side helpers (run once at init)
# --------------------------------------------------------------------------- #
def sinusoidal_pe(n, d):
    pos = jnp.arange(n, dtype=jnp.float32)[:, None]
    i = jnp.arange(d // 2, dtype=jnp.float32)[None, :]
    angles = pos / jnp.power(10000.0, (2.0 * i) / d)
    pe = jnp.zeros((n, d), dtype=jnp.float32)
    pe = pe.at[:, 0::2].set(jnp.sin(angles))
    pe = pe.at[:, 1::2].set(jnp.cos(angles))
    return pe


def init_params(key):
    ks = jax.random.split(key, 16)

    def w(k, shape, scale=0.05):
        return (scale * jax.random.normal(k, shape)).astype(jnp.float32)

    return {
        "qw": w(ks[0], (D_MODEL, D_MODEL)), "qb": w(ks[1], (1, D_MODEL)),
        "kw": w(ks[2], (D_MODEL, D_MODEL)), "kb": w(ks[3], (1, D_MODEL)),
        "vw": w(ks[4], (D_MODEL, D_MODEL)), "vb": w(ks[5], (1, D_MODEL)),
        "pw": w(ks[6], (D_MODEL, D_MODEL)), "pb": w(ks[7], (1, D_MODEL)),
        "w1": w(ks[8], (D_MODEL, D_FF)),    "b1": w(ks[9], (1, D_FF)),
        "w2": w(ks[10], (D_FF, D_MODEL)),   "b2": w(ks[11], (1, D_MODEL)),
        "g1": (1.0 + 0.1 * jax.random.normal(ks[12], (1, D_MODEL))).astype(jnp.float32),
        "be1": w(ks[13], (1, D_MODEL), 0.1),
        "g2": (1.0 + 0.1 * jax.random.normal(ks[14], (1, D_MODEL))).astype(jnp.float32),
        "be2": w(ks[15], (1, D_MODEL), 0.1),
    }


def pack_params(p, pe, B, N):
    """One-time packing of all parameters / constants into 3 DMA-friendly slabs."""
    HI = jax.lax.Precision.HIGHEST
    C, H, F, HD = D_MODEL, N_HEADS, D_FF, HEAD_DIM
    BN = B * N
    assert 3 * C + BN <= VEC_LANES and 4 * C <= VEC_LANES and 2 * C + F <= VEC_LANES

    # weight slab: [Wq | Wk | Wv | Wproj | W1]   (C, 3C + C + F)
    w_slab = jnp.concatenate(
        [p["qw"], p["kw"], p["vw"], p["pw"], p["w1"]], axis=1).astype(jnp.float32)

    # additive QKV slab: biases + PE hoisted through the Q/K weights (exact).
    pe_q = jnp.dot(pe, p["qw"], precision=HI)
    pe_k = jnp.dot(pe, p["kw"], precision=HI)
    pe_v = jnp.zeros((N, C), jnp.float32)                       # no PE on values
    qkv_add = (jnp.concatenate([pe_q, pe_k, pe_v], axis=1)
               + jnp.concatenate([p["qb"], p["kb"], p["vb"]], axis=1))   # (N, 3C)
    qkv_add = jnp.tile(qkv_add, (B, 1))                         # (BN, 3C)

    # constant masks (keeps iota / int-div / select out of the kernel)
    r = jnp.arange(BN)[:, None] // N
    c = jnp.arange(BN)[None, :] // N
    bmask = jnp.where(r == c, 0.0, -1e30).astype(jnp.float32)   # (BN, BN)
    hmask = (jnp.arange(C)[None, :] // HD ==
             jnp.arange(H)[:, None]).astype(jnp.float32)        # (H, C)

    # vector slab layout (rows x 128 lanes):
    #   rows [0, BN)    : qkv_add | bmask
    #   rows [BN, BN+H) : hmask
    #   row  BN+H       : proj bias | fc1 bias | fc2 bias
    #   row  BN+H+1     : gamma1 | beta1 | gamma2 | beta2
    rb, rl = BN + H, BN + H + 1
    n_rows = ((rl + 1 + 7) // 8) * 8
    vec = jnp.zeros((n_rows, VEC_LANES), jnp.float32)
    vec = vec.at[0:BN, 0:3 * C].set(qkv_add)
    vec = vec.at[0:BN, 3 * C:3 * C + BN].set(bmask)
    vec = vec.at[BN:BN + H, 0:C].set(hmask)
    vec = vec.at[rb, 0:C].set(p["pb"][0])
    vec = vec.at[rb, C:C + F].set(p["b1"][0])
    vec = vec.at[rb, C + F:2 * C + F].set(p["b2"][0])
    vec = vec.at[rl, 0:C].set(p["g1"][0])
    vec = vec.at[rl, C:2 * C].set(p["be1"][0])
    vec = vec.at[rl, 2 * C:3 * C].set(p["g2"][0])
    vec = vec.at[rl, 3 * C:4 * C].set(p["be2"][0])

    return w_slab, p["w2"].astype(jnp.float32), vec


def encoder_layer(x, packed):
    """Gridless single-block call: whole problem + packed params live in VMEM."""
    w_slab, w2, vec = packed
    B, N, C = x.shape
    return pl.pallas_call(
        encoder_layer_kernel,
        out_shape=jax.ShapeDtypeStruct((B, N, C), jnp.float32),
        # out reuses x's HBM buffer (same shape/dtype; x is fully loaded into
        # VMEM before the epilogue writeback, so the alias is safe).
        input_output_aliases={0: 0},
    )(x, w_slab, w2, vec)


# --------------------------------------------------------------------------- #
# Pure-JAX reference mirroring the PyTorch forward (eval mode)
# --------------------------------------------------------------------------- #
def encoder_layer_ref(x, pe, p):
    HI = jax.lax.Precision.HIGHEST
    B, N, C = x.shape
    x_pe = x + pe[None]
    q = jnp.dot(x_pe, p["qw"], precision=HI) + p["qb"]
    k = jnp.dot(x_pe, p["kw"], precision=HI) + p["kb"]
    v = jnp.dot(x, p["vw"], precision=HI) + p["vb"]
    qh = q.reshape(B, N, N_HEADS, HEAD_DIM)
    kh = k.reshape(B, N, N_HEADS, HEAD_DIM)
    vh = v.reshape(B, N, N_HEADS, HEAD_DIM)
    scores = jnp.einsum('bnhd,bmhd->bhnm', qh, kh, precision=HI) * (HEAD_DIM ** -0.5)
    att = jax.nn.softmax(scores, axis=3)
    att_out = jnp.einsum('bhnm,bmhd->bnhd', att, vh, precision=HI).reshape(B, N, C)
    attn = jnp.dot(att_out, p["pw"], precision=HI) + p["pb"]
    y = _layernorm(x + attn, p["g1"], p["be1"])
    h = jnp.maximum(jnp.dot(y, p["w1"], precision=HI) + p["b1"], 0.0)
    m = jnp.dot(h, p["w2"], precision=HI) + p["b2"]
    return _layernorm(y + m, p["g2"], p["be2"])


if __name__ == "__main__":
    key = jax.random.PRNGKey(0)
    k_x, k_p = jax.random.split(key)

    B, N, C = 2, 8, D_MODEL
    x = jax.random.normal(k_x, (B, N, C), dtype=jnp.float32)
    pe = sinusoidal_pe(N, C)
    params = init_params(k_p)
    packed = pack_params(params, pe, B, N)      # one-time packing, not per call

    # Reference first: x's HBM buffer may be donated to the kernel output.
    ref = encoder_layer_ref(x, pe, params)

    out = jax.block_until_ready(encoder_layer(x, packed))

    assert out.shape == (B, N, C)
    max_diff = float(jnp.max(jnp.abs(out - ref)))
    # f32 everywhere + exact softmax: expected diff ~1e-6; tolerance kept
    # conservative to absorb MXU multi-pass rounding differences across chips.
    assert jnp.allclose(out, ref, atol=2e-3, rtol=2e-3), f"max abs diff {max_diff}"

    print("KERNEL_OK")
</pallas_src>

<mosaic_0001>
module attributes {stable_mosaic.version = 11 : i64} {
  func.func @encoder_layer_kernel(%arg0: memref<2x8x32xf32, #tpu.memory_space<vmem>>, %arg1: memref<32x192xf32, #tpu.memory_space<vmem>>, %arg2: memref<64x32xf32, #tpu.memory_space<vmem>>, %arg3: memref<32x128xf32, #tpu.memory_space<vmem>>, %arg4: memref<2x8x32xf32, #tpu.memory_space<vmem>>) attributes {dimension_semantics = [], scalar_prefetch = 0 : i64, scratch_operands = 0 : i64, tpu.core_type = #tpu.core_type<tc>} {
    %c0 = arith.constant 0 : index
    %c0_0 = arith.constant 0 : index
    %c0_1 = arith.constant 0 : index
    %0 = vector.load %arg0[%c0, %c0_0, %c0_1] : memref<2x8x32xf32, #tpu.memory_space<vmem>>, vector<2x8x32xf32>
    %1 = vector.shape_cast %0 : vector<2x8x32xf32> to vector<16x32xf32>
    %c0_2 = arith.constant 0 : index
    %c0_3 = arith.constant 0 : index
    %2 = vector.load %arg1[%c0_2, %c0_3] : memref<32x192xf32, #tpu.memory_space<vmem>>, vector<32x192xf32>
    %3 = vector.extract_strided_slice %2 {offsets = [0, 0], sizes = [32, 96], strides = [1, 1]} : vector<32x192xf32> to vector<32x96xf32>
    %4 = vector.extract_strided_slice %2 {offsets = [0, 96], sizes = [32, 32], strides = [1, 1]} : vector<32x192xf32> to vector<32x32xf32>
    %5 = vector.extract_strided_slice %2 {offsets = [0, 128], sizes = [32, 64], strides = [1, 1]} : vector<32x192xf32> to vector<32x64xf32>
    %c0_4 = arith.constant 0 : index
    %c0_5 = arith.constant 0 : index
    %6 = vector.load %arg2[%c0_4, %c0_5] : memref<64x32xf32, #tpu.memory_space<vmem>>, vector<64x32xf32>
    %c0_6 = arith.constant 0 : index
    %c0_7 = arith.constant 0 : index
    %7 = vector.load %arg3[%c0_6, %c0_7] : memref<32x128xf32, #tpu.memory_space<vmem>>, vector<32x128xf32>
    %8 = vector.extract_strided_slice %7 {offsets = [0, 0], sizes = [16, 96], strides = [1, 1]} : vector<32x128xf32> to vector<16x96xf32>
    %9 = vector.extract_strided_slice %7 {offsets = [0, 96], sizes = [16, 16], strides = [1, 1]} : vector<32x128xf32> to vector<16x16xf32>
    %10 = vector.extract_strided_slice %7 {offsets = [16, 0], sizes = [8, 32], strides = [1, 1]} : vector<32x128xf32> to vector<8x32xf32>
    %11 = vector.extract_strided_slice %7 {offsets = [24, 0], sizes = [1, 32], strides = [1, 1]} : vector<32x128xf32> to vector<1x32xf32>
    %12 = vector.extract_strided_slice %7 {offsets = [24, 32], sizes = [1, 64], strides = [1, 1]} : vector<32x128xf32> to vector<1x64xf32>
    %13 = vector.extract_strided_slice %7 {offsets = [24, 96], sizes = [1, 32], strides = [1, 1]} : vector<32x128xf32> to vector<1x32xf32>
    %14 = vector.extract_strided_slice %7 {offsets = [25, 0], sizes = [1, 32], strides = [1, 1]} : vector<32x128xf32> to vector<1x32xf32>
    %15 = vector.extract_strided_slice %7 {offsets = [25, 32], sizes = [1, 32], strides = [1, 1]} : vector<32x128xf32> to vector<1x32xf32>
    %16 = vector.extract_strided_slice %7 {offsets = [25, 64], sizes = [1, 32], strides = [1, 1]} : vector<32x128xf32> to vector<1x32xf32>
    %17 = vector.extract_strided_slice %7 {offsets = [25, 96], sizes = [1, 32], strides = [1, 1]} : vector<32x128xf32> to vector<1x32xf32>
    %cst = arith.constant dense<0.000000e+00> : vector<16x96xf32>
    %18 = tpu.matmul %1, %3, %cst {dimension_numbers = #tpu.dot_dimension_numbers<[1], [0], [0], [1], [0, 0, 1, 1], [], []>} : vector<16x32xf32>, vector<32x96xf32>, vector<16x96xf32> -> vector<16x96xf32>
    %19 = arith.addf %18, %8 : vector<16x96xf32>
    %20 = vector.extract_strided_slice %19 {offsets = [0, 0], sizes = [16, 32], strides = [1, 1]} : vector<16x96xf32> to vector<16x32xf32>
    %21 = vector.extract_strided_slice %19 {offsets = [0, 32], sizes = [16, 32], strides = [1, 1]} : vector<16x96xf32> to vector<16x32xf32>
    %22 = vector.extract_strided_slice %19 {offsets = [0, 64], sizes = [16, 32], strides = [1, 1]} : vector<16x96xf32> to vector<16x32xf32>
    %23 = vector.shape_cast %10 : vector<8x32xf32> to vector<8x1x32xf32>
    %24 = vector.shape_cast %20 : vector<16x32xf32> to vector<1x16x32xf32>
    %25 = vector.broadcast %24 : vector<1x16x32xf32> to vector<8x16x32xf32>
    %26 = vector.broadcast %23 : vector<8x1x32xf32> to vector<8x16x32xf32>
    %27 = arith.mulf %25, %26 : vector<8x16x32xf32>
    %28 = vector.shape_cast %27 : vector<8x16x32xf32> to vector<128x32xf32>
    %cst_8 = arith.constant dense<0.000000e+00> : vector<128x16xf32>
    %29 = tpu.matmul %28, %21, %cst_8 {dimension_numbers = #tpu.dot_dimension_numbers<[1], [1], [0], [0], [0, 0, 1, 0], [], []>} : vector<128x32xf32>, vector<16x32xf32>, vector<128x16xf32> -> vector<128x16xf32>
    %30 = vector.shape_cast %29 : vector<128x16xf32> to vector<8x16x16xf32>
    %cst_9 = arith.constant 5.000000e-01 : f32
    %31 = vector.broadcast %cst_9 : f32 to vector<8x16x16xf32>
    %32 = arith.mulf %30, %31 : vector<8x16x16xf32>
    %33 = vector.shape_cast %9 : vector<16x16xf32> to vector<1x16x16xf32>
    %34 = vector.broadcast %33 : vector<1x16x16xf32> to vector<8x16x16xf32>
    %35 = arith.addf %32, %34 : vector<8x16x16xf32>
    %cst_10 = arith.constant dense<0xFF800000> : vector<8x16xf32>
    %36 = vector.multi_reduction <maximumf>, %35, %cst_10 [2] : vector<8x16x16xf32> to vector<8x16xf32>
    %37 = vector.shape_cast %36 : vector<8x16xf32> to vector<8x16x1xf32>
    %38 = vector.broadcast %37 : vector<8x16x1xf32> to vector<8x16x16xf32>
    %39 = arith.subf %35, %38 : vector<8x16x16xf32>
    %40 = math.exp %39 : vector<8x16x16xf32>
    %cst_11 = arith.constant dense<0.000000e+00> : vector<8x16xf32>
    %41 = vector.multi_reduction <add>, %40, %cst_11 [2] : vector<8x16x16xf32> to vector<8x16xf32>
    %42 = vector.shape_cast %41 : vector<8x16xf32> to vector<8x16x1xf32>
    %43 = vector.broadcast %42 : vector<8x16x1xf32> to vector<8x16x16xf32>
    %44 = arith.divf %40, %43 : vector<8x16x16xf32>
    %45 = vector.shape_cast %44 : vector<8x16x16xf32> to vector<128x16xf32>
    %cst_12 = arith.constant dense<0.000000e+00> : vector<128x32xf32>
    %46 = tpu.matmul %45, %22, %cst_12 {dimension_numbers = #tpu.dot_dimension_numbers<[1], [0], [0], [1], [0, 0, 1, 1], [], []>} : vector<128x16xf32>, vector<16x32xf32>, vector<128x32xf32> -> vector<128x32xf32>
    %47 = vector.shape_cast %46 : vector<128x32xf32> to vector<8x16x32xf32>
    %48 = vector.broadcast %23 : vector<8x1x32xf32> to vector<8x16x32xf32>
    %49 = arith.mulf %47, %48 : vector<8x16x32xf32>
    %cst_13 = arith.constant dense<0.000000e+00> : vector<16x32xf32>
    %50 = vector.multi_reduction <add>, %49, %cst_13 [0] : vector<8x16x32xf32> to vector<16x32xf32>
    %cst_14 = arith.constant dense<0.000000e+00> : vector<16x32xf32>
    %51 = tpu.matmul %50, %4, %cst_14 {dimension_numbers = #tpu.dot_dimension_numbers<[1], [0], [0], [1], [0, 0, 1, 1], [], []>} : vector<16x32xf32>, vector<32x32xf32>, vector<16x32xf32> -> vector<16x32xf32>
    %52 = vector.broadcast %11 : vector<1x32xf32> to vector<16x32xf32>
    %53 = arith.addf %51, %52 : vector<16x32xf32>
    %54 = arith.addf %1, %53 : vector<16x32xf32>
    %cst_15 = arith.constant dense<0.000000e+00> : vector<16xf32>
    %55 = vector.multi_reduction <add>, %54, %cst_15 [1] : vector<16x32xf32> to vector<16xf32>
    %56 = vector.shape_cast %55 : vector<16xf32> to vector<16x1xf32>
    %cst_16 = arith.constant 3.200000e+01 : f32
    %57 = vector.broadcast %cst_16 : f32 to vector<16x1xf32>
    %58 = arith.divf %56, %57 : vector<16x1xf32>
    %59 = vector.broadcast %58 : vector<16x1xf32> to vector<16x32xf32>
    %60 = arith.subf %54, %59 : vector<16x32xf32>
    %61 = arith.mulf %60, %60 : vector<16x32xf32>
    %cst_17 = arith.constant dense<0.000000e+00> : vector<16xf32>
    %62 = vector.multi_reduction <add>, %61, %cst_17 [1] : vector<16x32xf32> to vector<16xf32>
    %63 = vector.shape_cast %62 : vector<16xf32> to vector<16x1xf32>
    %cst_18 = arith.constant 3.200000e+01 : f32
    %64 = vector.broadcast %cst_18 : f32 to vector<16x1xf32>
    %65 = arith.divf %63, %64 : vector<16x1xf32>
    %66 = vector.broadcast %58 : vector<16x1xf32> to vector<16x32xf32>
    %67 = arith.subf %54, %66 : vector<16x32xf32>
    %cst_19 = arith.constant 9.99999974E-6 : f32
    %68 = vector.broadcast %cst_19 : f32 to vector<16x1xf32>
    %69 = arith.addf %65, %68 : vector<16x1xf32>
    %70 = math.rsqrt %69 : vector<16x1xf32>
    %71 = vector.broadcast %70 : vector<16x1xf32> to vector<16x32xf32>
    %72 = arith.mulf %67, %71 : vector<16x32xf32>
    %73 = vector.broadcast %14 : vector<1x32xf32> to vector<16x32xf32>
    %74 = arith.mulf %72, %73 : vector<16x32xf32>
    %75 = vector.broadcast %15 : vector<1x32xf32> to vector<16x32xf32>
    %76 = arith.addf %74, %75 : vector<16x32xf32>
    %cst_20 = arith.constant dense<0.000000e+00> : vector<16x64xf32>
    %77 = tpu.matmul %76, %5, %cst_20 {dimension_numbers = #tpu.dot_dimension_numbers<[1], [0], [0], [1], [0, 0, 1, 1], [], []>} : vector<16x32xf32>, vector<32x64xf32>, vector<16x64xf32> -> vector<16x64xf32>
    %78 = vector.broadcast %12 : vector<1x64xf32> to vector<16x64xf32>
    %79 = arith.addf %77, %78 : vector<16x64xf32>
    %cst_21 = arith.constant 0.000000e+00 : f32
    %80 = vector.broadcast %cst_21 : f32 to vector<16x64xf32>
    %81 = arith.maximumf %79, %80 : vector<16x64xf32>
    %cst_22 = arith.constant dense<0.000000e+00> : vector<16x32xf32>
    %82 = tpu.matmul %81, %6, %cst_22 {dimension_numbers = #tpu.dot_dimension_numbers<[1], [0], [0], [1], [0, 0, 1, 1], [], []>} : vector<16x64xf32>, vector<64x32xf32>, vector<16x32xf32> -> vector<16x32xf32>
    %83 = vector.broadcast %13 : vector<1x32xf32> to vector<16x32xf32>
    %84 = arith.addf %82, %83 : vector<16x32xf32>
    %85 = arith.addf %76, %84 : vector<16x32xf32>
    %cst_23 = arith.constant dense<0.000000e+00> : vector<16xf32>
    %86 = vector.multi_reduction <add>, %85, %cst_23 [1] : vector<16x32xf32> to vector<16xf32>
    %87 = vector.shape_cast %86 : vector<16xf32> to vector<16x1xf32>
    %cst_24 = arith.constant 3.200000e+01 : f32
    %88 = vector.broadcast %cst_24 : f32 to vector<16x1xf32>
    %89 = arith.divf %87, %88 : vector<16x1xf32>
    %90 = vector.broadcast %89 : vector<16x1xf32> to vector<16x32xf32>
    %91 = arith.subf %85, %90 : vector<16x32xf32>
    %92 = arith.mulf %91, %91 : vector<16x32xf32>
    %cst_25 = arith.constant dense<0.000000e+00> : vector<16xf32>
    %93 = vector.multi_reduction <add>, %92, %cst_25 [1] : vector<16x32xf32> to vector<16xf32>
    %94 = vector.shape_cast %93 : vector<16xf32> to vector<16x1xf32>
    %cst_26 = arith.constant 3.200000e+01 : f32
    %95 = vector.broadcast %cst_26 : f32 to vector<16x1xf32>
    %96 = arith.divf %94, %95 : vector<16x1xf32>
    %97 = vector.broadcast %89 : vector<16x1xf32> to vector<16x32xf32>
    %98 = arith.subf %85, %97 : vector<16x32xf32>
    %cst_27 = arith.constant 9.99999974E-6 : f32
    %99 = vector.broadcast %cst_27 : f32 to vector<16x1xf32>
    %100 = arith.addf %96, %99 : vector<16x1xf32>
    %101 = math.rsqrt %100 : vector<16x1xf32>
    %102 = vector.broadcast %101 : vector<16x1xf32> to vector<16x32xf32>
    %103 = arith.mulf %98, %102 : vector<16x32xf32>
    %104 = vector.broadcast %16 : vector<1x32xf32> to vector<16x32xf32>
    %105 = arith.mulf %103, %104 : vector<16x32xf32>
    %106 = vector.broadcast %17 : vector<1x32xf32> to vector<16x32xf32>
    %107 = arith.addf %105, %106 : vector<16x32xf32>
    %108 = vector.shape_cast %107 : vector<16x32xf32> to vector<2x8x32xf32>
    %c0_28 = arith.constant 0 : index
    %c0_29 = arith.constant 0 : index
    %c0_30 = arith.constant 0 : index
    %109 = vector.load %arg4[%c0_28, %c0_29, %c0_30] : memref<2x8x32xf32, #tpu.memory_space<vmem>>, vector<2x8x32xf32>
    tpu.vector_store %arg4[%c0_28, %c0_29, %c0_30], %108 {strides = array<i32>} : memref<2x8x32xf32, #tpu.memory_space<vmem>>, vector<2x8x32xf32>,
    return
  }
}

</mosaic_0001>

<bundles_post_ra>
// kernel: tpu_custom_call.1
= control target key start
LH: loop header
LB: loop body
LE: loop exit
PB: predicated region body
PF: predicated region fallthrough
CT: control target
= control target key end

     0   :  { %9 = vsyncpa [#allocation3], 0  ;;  %s2121_s0 = inlined_call_operand.hbm [shape: f32[2,8,32], index: 0, kind: input, shape index: {}, may-alias: {0,4}]   ;;  %s2122_s1 = inlined_call_operand.vmem [shape: f32[32,192], index: 1, kind: input, shape index: {}]   ;;  %s2123_s2 = inlined_call_operand.vmem [shape: f32[64,32], index: 2, kind: input, shape index: {}]   ;;  %s2124_s3 = inlined_call_operand.vmem [shape: f32[32,128], index: 3, kind: input, shape index: {}]   ;;  %s2125_s4 = inlined_call_operand.hbm [shape: f32[2,8,32], index: 4, kind: output, shape index: {}, may-alias: {0,4}]  }
   0x1   :  { %10 = vsyncpa [#allocation4], 0  ;;  %s1621_s15 = smov [#allocation2]  }
   0x2   :  { %s16_s16 = sshll.u32 %s1621_s15, 4  ;;  %s17_s16 = int_to_ptr.vmem [resolvable:$true] %s16_s16 }
   0x3   :  { %s1585_s17 = scalar_lea.vmem %s17_s16, 256  ;;  %p1590_p1 = scmp.lt.s32.totalorder %s17_s16, %s17_s16 }
   0x4   :  { %p1586_p0 = scmp.ne.s32.totalorder %s17_s16, %s1585_s17  ;;  %p1591_p2 = scmp.lt.s32.totalorder %s1585_s17, %s1585_s17 }
   0x6   :  { %p1592_p3 = por %p1591_p2, %p1590_p1 }
   0x8   :  { %p1593_p4 = pnand %p1592_p3, %p1586_p0 }
   0xa   :  { %1596 = shalt.err (!%p1593_p4)
}
   0xb   :  { %s1622_s18 = smov 128   ;;  %s1623_s19 = smov 8  }
   0xc   :  { %22 = dma.hbm_to_vmem [thread:$0]  %s2121_s0, 256, %s17_s16, [#allocation3], %s1622_s18, %s1622_s18, %s1623_s19  }
   0xd   :  { %1617 = dma.done.wait [#allocation3], 256  }
   0xe   :  { %1618 = vsyncadd [#allocation3], 4294967040  ;;  %vm54_vm0 = vcmask 261120   ;;  %v1663_v0 = vld [vmem:[%s2122_s1 + $0x30] sm:$0xff]  ;;  %v1668_v1 = vld [vmem:[%s2122_s1 + $0x20] sm:$0xff]  ;;  %v141_v8 = vlaneseq  ;;  %s1625_s9 = smov 96  }
   0xf   :  { %1384 = vmatprep.subr.mxu0 %v1663_v0  ;;  %v1671_v2 = vld [vmem:[#allocation2] sm:$0xff]  ;;  %v1677_v3 = vld [vmem:[%s2122_s1 + $0x10] sm:$0xff]  ;;  %v1690_v5 = vld [vmem:[#allocation2 + $0x8] sm:$0xff]  ;;  %v1624_v6 = vmov 1966171168   ;;  %s1626_s10 = smov 32  }
  0x10   :  { %1385 = vmatpush3.msra.mxu0 %v1663_v0  ;;  %1392 = vmatprep.mubr.msk.f32.mxu0 %vm54_vm0, %v1671_v2  ;;  %v1686_v4 = vld [vmem:[%s2122_s1] sm:$0xff]  ;;  %v139_v7 = vunpack.c.l.s4 %v1624_v6  ;;  %v1696_v10 = vshrl.u32 %v141_v8, 7  ;;  %v52_v11 = vld [vmem:[%s2124_s3 + $0x10] sm:$0xff]  ;;  %v51_v20 = vld [vmem:[%s2124_s3 + $0x8] sm:$0xff]  ;;  %vm485_vm1 = vcmask 130048   ;;  %s1627_s11 = smov 64  }
  0x11   :  { %1386 = vmatprep.subr.mxu0 %v1668_v1  ;;  %v137_v13 = vcombine.high %v52_v11, %v52_v11  ;;  %v50_v23 = vld [vmem:[%s2124_s3] sm:$0xff]  ;;  %vm1139_vm2 = vcmask 523264  }
  0x12   :  { %1387 = vmatpush3.msra.mxu0 %v1668_v1  ;;  %v140_v9 = vunpack.c.0.s8 %v139_v7  ;;  %v1708_v21 = vsub.s32 0, %v1696_v10  ;;  %463 = vrot.lane.b32.xlu1 %v50_v23, %s1626_s10 }
  0x13   :  { %1388 = vmatprep.subr.mxu0 %v1677_v3 }
  0x14   :  { %1389 = vmatpush3.msra.mxu0 %v1677_v3  ;;  %v143_v12 = vsub.s32 %v140_v9, %v1696_v10 }
  0x15   :  { %1390 = vmatprep.subr.mxu0 %v1686_v4 }
  0x16   :  { %1391 = vmatpush3.msra.mxu0 %v1686_v4  ;;  %v151_v14 = vrot.slane %v137_v13, %v143_v12  ;;  %v144_v18 = vrot.slane %v52_v11, %v143_v12  ;;  %465 = vrot.lane.b32.xlu1 %v51_v20, %s1626_s10 }
  0x17   :  { %1393 = vmatmul.mubr.msk.f32.vlgmr.msra.gmra.mxu0 %vm54_vm0, %v1690_v5 }
  0x18   :  { %v153_v15 = vcombine.high %v151_v14, %v151_v14  ;;  %v167_v16 = vrot.slane %v151_v14, %v143_v12  ;;  %v152_v19 = vcombine.high %v144_v18, %v144_v18  ;;  %v160_v25 = vrot.slane %v144_v18, %v143_v12 }
  0x1a   :  { %v1702_v17 = vrot.slane %v153_v15, %v143_v12  ;;  %v174_v26 = vrot.slane %v152_v19, %v143_v12  ;;  %v1720_v29 = vrot.slane %v160_v25, %v1708_v21  ;;  %v182_v34 = vcombine.high %v160_v25, %v160_v25 }
  0x1b   :  { %v1765_v44 = vrot.slane %v167_v16, %v1708_v21  ;;  %v183_v48 = vcombine.high %v167_v16, %v167_v16 }
  0x1c   :  { %v1723_v30 = vrot.slane %v174_v26, %v1708_v21  ;;  %v184_v36 = vcombine.high %v174_v26, %v174_v26  ;;  %v1744_v37 = vrot.slane %v182_v34, %v1708_v21  ;;  %v1775_v47 = vrot.slane %v1702_v17, %v1708_v21 }
  0x1d   :  { %v1784_v51 = vrot.slane %v183_v48, %v1708_v21  ;;  %v185_v52 = vcombine.high %v1702_v17, %v1702_v17 }
  0x1e   :  { %v1756_v41 = vrot.slane %v184_v36, %v1708_v21 }
  0x1f   :  { %v1795_v55 = vrot.slane %v185_v52, %v1708_v21 }
  0x84   :  { %v1806_v59 = vpop.permute.xlu1 %463 }
  0x88   :  { %v1808_v60 = vpop.permute.xlu1 %465 }
  0xd7   :  { %v1394_v22 = vpop.f32.mrf.mxu0 }
  0xd8   :  { %v1713_v24 = vadd.f32 %v1394_v22, %v51_v20 }
  0xd9   :  { %v127_v27 = vpop.f32.mrf.mxu0 }
  0xda   :  { %v1715_v28 = vadd.f32 %v127_v27, %v50_v23  ;;  %246 = vrot.lane.b32.xlu0 %v1713_v24, %s1625_s9  ;;  %v227_v38 = vmul.f32 %v1720_v29, %v1713_v24  ;;  %v229_v39 = vmul.f32 %v1723_v30, %v1713_v24  ;;  %v231_v42 = vmul.f32 %v1744_v37, %v1713_v24 }
  0xdb   :  { %v233_v45 = vmul.f32 %v1756_v41, %v1713_v24  ;;  %v235_v49 = vmul.f32 %v1765_v44, %v1713_v24  ;;  %v237_v53 = vmul.f32 %v1775_v47, %v1713_v24  ;;  %v239_v56 = vmul.f32 %v1784_v51, %v1713_v24 }
  0xdc   :  { %v226_v31 = vmul.f32 %v1720_v29, %v1715_v28  ;;  %v228_v32 = vmul.f32 %v1723_v30, %v1715_v28  ;;  %v230_v40 = vmul.f32 %v1744_v37, %v1715_v28  ;;  %v232_v43 = vmul.f32 %v1756_v41, %v1715_v28 }
  0xdd   :  { %v234_v46 = vmul.f32 %v1765_v44, %v1715_v28  ;;  %v236_v50 = vmul.f32 %v1775_v47, %v1715_v28  ;;  %v238_v54 = vmul.f32 %v1784_v51, %v1715_v28  ;;  %v240_v57 = vmul.f32 %v1795_v55, %v1715_v28 }
  0xde   :  { %244 = vrot.lane.b32.xlu0 %v1715_v28, %s1625_s9  ;;  %1399 = vmatprep.mubr.msk.f32.mxu0 %vm54_vm0, %v226_v31  ;;  %v241_v58 = vmul.f32 %v1795_v55, %v1713_v24 }
  0xdf   :  { %1402 = vmatprep.mubr.msk.f32.mxu1 %vm54_vm0, %v228_v32 }
 0x14c   :  { %v247_v33 = vpop.permute.xlu0 %246 }
 0x14d   :  { %1395 = vmatprep.subr.msk.mxu0 %vm54_vm0, %v247_v33  ;;  %1492 = vmatprep.subr.msk.mxu1 %vm54_vm0, %v247_v33 }
 0x14e   :  { %1396 = vmatpush3.xpose.msk.msra.mxu0 %vm54_vm0, %v247_v33  ;;  %1494 = vmatpush3.xpose.msk.msra.mxu1 %vm54_vm0, %v247_v33 }
 0x150   :  { %v245_v35 = vpop.permute.xlu0 %244 }
 0x151   :  { %1397 = vmatprep.subr.msk.mxu0 %vm54_vm0, %v245_v35  ;;  %1493 = vmatprep.subr.msk.mxu1 %vm54_vm0, %v245_v35 }
 0x152   :  { %1398 = vmatpush3.xpose.msk.msra.mxu0 %vm54_vm0, %v245_v35  ;;  %1495 = vmatpush3.xpose.msk.msra.mxu1 %vm54_vm0, %v245_v35 }
 0x155   :  { %1400 = vmatmul.mubr.msk.f32.vlgmr.msra.gmra.mxu0 %vm54_vm0, %v227_v38  ;;  %1403 = vmatmul.mubr.msk.f32.vlgmr.msra.gmra.mxu1 %vm54_vm0, %v229_v39 }
 0x156   :  { %1405 = vmatprep.mubr.msk.f32.mxu1 %vm54_vm0, %v230_v40 }
 0x159   :  { %1406 = vmatmul.mubr.msk.f32.gmra.mxu1 %vm54_vm0, %v231_v42 }
 0x15a   :  { %1408 = vmatprep.mubr.msk.f32.mxu1 %vm54_vm0, %v232_v43 }
 0x15d   :  { %1409 = vmatmul.mubr.msk.f32.gmra.mxu1 %vm54_vm0, %v233_v45 }
 0x15e   :  { %1411 = vmatprep.mubr.msk.f32.mxu1 %vm54_vm0, %v234_v46 }
 0x161   :  { %1412 = vmatmul.mubr.msk.f32.gmra.mxu1 %vm54_vm0, %v235_v49 }
 0x162   :  { %1414 = vmatprep.mubr.msk.f32.mxu1 %vm54_vm0, %v236_v50 }
 0x165   :  { %1415 = vmatmul.mubr.msk.f32.gmra.mxu1 %vm54_vm0, %v237_v53 }
 0x166   :  { %1417 = vmatprep.mubr.msk.f32.mxu1 %vm54_vm0, %v238_v54 }
 0x169   :  { %1418 = vmatmul.mubr.msk.f32.gmra.mxu1 %vm54_vm0, %v239_v56 }
 0x16a   :  { %1420 = vmatprep.mubr.msk.f32.mxu1 %vm54_vm0, %v240_v57 }
 0x16d   :  { %1421 = vmatmul.mubr.msk.f32.gmra.mxu1 %vm54_vm0, %v241_v58 }
 0x215   :  { %v1401_v61 = vpop.f32.mrf.mxu0  ;;  %v1404_v62 = vpop.f32.mrf.mxu1 }
 0x216   :  { %v446_v63 = vmul.f32 0.5, %v1401_v61  ;;  %v448_v15 = vmul.f32 0.5, %v1404_v62 }
 0x217   :  { %v366_v6 = vpop.f32.mrf.mxu0  ;;  %v376_v7 = vpop.f32.mrf.mxu1 }
 0x218   :  { %v445_v8 = vmul.f32 0.5, %v366_v6  ;;  %v447_v9 = vmul.f32 0.5, %v376_v7  ;;  %v1811_v11 = vadd.f32 %v1808_v60, %v446_v63  ;;  %v1827_v25 = vadd.f32 %v1808_v60, %v448_v15 }
 0x219   :  { %v1407_v12 = vpop.f32.mrf.mxu1 }
 0x21a   :  { %v489_v13 = vsel %vm485_vm1, %v1811_v11, -inf  ;;  %v1816_v14 = vadd.f32 %v1806_v59, %v445_v8  ;;  %v1821_v19 = vadd.f32 %v1806_v59, %v447_v9  ;;  %v450_v26 = vmul.f32 0.5, %v1407_v12 }
 0x21b   :  { %v386_v16 = vpop.f32.mrf.mxu1  ;;  %490 = vmax.xlane.f32.xlu1 %v489_v13  ;;  %v495_v36 = vsel %vm485_vm1, %v1827_v25, -inf }
 0x21c   :  { %v449_v17 = vmul.f32 0.5, %v386_v16  ;;  %v486_v18 = vsel %vm485_vm1, %v1816_v14, -inf  ;;  %v492_v32 = vsel %vm485_vm1, %v1821_v19, -inf  ;;  %v1841_v42 = vadd.f32 %v1808_v60, %v450_v26 }
 0x21d   :  { %v1410_v20 = vpop.f32.mrf.mxu1  ;;  %487 = vmax.xlane.f32.xlu0 %v486_v18 }
 0x21e   :  { %v1824_v22 = vadd.f32 %v1806_v59, %v449_v17  ;;  %v452_v38 = vmul.f32 0.5, %v1410_v20  ;;  %v501_v52 = vsel %vm485_vm1, %v1841_v42, -inf }
 0x21f   :  { %v396_v23 = vpop.f32.mrf.mxu1 }
 0x220   :  { %v451_v27 = vmul.f32 0.5, %v396_v23  ;;  %v498_v31 = vsel %vm485_vm1, %v1824_v22, -inf  ;;  %v1851_v53 = vadd.f32 %v1808_v60, %v452_v38 }
 0x221   :  { %v1413_v33 = vpop.f32.mrf.mxu1  ;;  %499 = vmax.xlane.f32.xlu1 %v498_v31  ;;  %493 = vmax.xlane.f32.xlu0 %v492_v32 }
 0x222   :  { %v1834_v34 = vadd.f32 %v1806_v59, %v451_v27  ;;  %v454_v46 = vmul.f32 0.5, %v1413_v33  ;;  %v507_v6 = vsel %vm485_vm1, %v1851_v53, -inf }
 0x223   :  { %v406_v35 = vpop.f32.mrf.mxu1 }
 0x224   :  { %v453_v39 = vmul.f32 0.5, %v406_v35  ;;  %v504_v40 = vsel %vm485_vm1, %v1834_v34, -inf  ;;  %v1857_v58 = vadd.f32 %v1808_v60, %v454_v46 }
 0x225   :  { %v1416_v43 = vpop.f32.mrf.mxu1  ;;  %505 = vmax.xlane.f32.xlu1 %v504_v40  ;;  %496 = vmax.xlane.f32.xlu0 %v495_v36 }
 0x226   :  { %v1844_v45 = vadd.f32 %v1806_v59, %v453_v39  ;;  %v456_v61 = vmul.f32 0.5, %v1416_v43  ;;  %v513_v12 = vsel %vm485_vm1, %v1857_v58, -inf }
 0x227   :  { %v416_v48 = vpop.f32.mrf.mxu1 }
 0x228   :  { %v455_v49 = vmul.f32 0.5, %v416_v48  ;;  %v510_v50 = vsel %vm485_vm1, %v1844_v45, -inf  ;;  %v1871_v17 = vadd.f32 %v1808_v60, %v456_v61 }
 0x229   :  { %v1419_v54 = vpop.f32.mrf.mxu1  ;;  %511 = vmax.xlane.f32.xlu1 %v510_v50  ;;  %502 = vmax.xlane.f32.xlu0 %v501_v52 }
 0x22a   :  { %v1854_v56 = vadd.f32 %v1806_v59, %v455_v49  ;;  %v458_v13 = vmul.f32 0.5, %v1419_v54  ;;  %v519_v26 = vsel %vm485_vm1, %v1871_v17, -inf }
 0x22b   :  { %v426_v57 = vpop.f32.mrf.mxu1 }
 0x22c   :  { %v457_v62 = vmul.f32 0.5, %v426_v57  ;;  %v516_v63 = vsel %vm485_vm1, %v1854_v56, -inf  ;;  %v1881_v27 = vadd.f32 %v1808_v60, %v458_v13 }
 0x22d   :  { %v1422_v7 = vpop.f32.mrf.mxu1  ;;  %517 = vmax.xlane.f32.xlu1 %v516_v63  ;;  %508 = vmax.xlane.f32.xlu0 %v507_v6 }
 0x22e   :  { %v1864_v8 = vadd.f32 %v1806_v59, %v457_v62  ;;  %v460_v20 = vmul.f32 0.5, %v1422_v7  ;;  %v525_v31 = vsel %vm485_vm1, %v1881_v27, -inf }
 0x22f   :  { %v436_v9 = vpop.f32.mrf.mxu1 }
 0x230   :  { %v459_v15 = vmul.f32 0.5, %v436_v9  ;;  %v522_v16 = vsel %vm485_vm1, %v1864_v8, -inf  ;;  %v1886_v32 = vadd.f32 %v1808_v60, %v460_v20 }
 0x231   :  { %523 = vmax.xlane.f32.xlu1 %v522_v16  ;;  %514 = vmax.xlane.f32.xlu0 %v513_v12 }
 0x232   :  { %v1874_v18 = vadd.f32 %v1806_v59, %v459_v15  ;;  %v531_v59 = vsel %vm485_vm1, %v1886_v32, -inf }
 0x234   :  { %v528_v23 = vsel %vm485_vm1, %v1874_v18, -inf }
 0x235   :  { %529 = vmax.xlane.f32.xlu1 %v528_v23  ;;  %520 = vmax.xlane.f32.xlu0 %v519_v26 }
 0x239   :  { %526 = vmax.xlane.f32.xlu0 %v525_v31 }
 0x23d   :  { %532 = vmax.xlane.f32.xlu0 %v531_v59 }
 0x246   :  { %664 = vrot.lane.b32.xlu1 %v1713_v24, %s1627_s11 }
 0x253   :  { %662 = vrot.lane.b32.xlu0 %v1715_v28, %s1627_s11 }
 0x2a4   :  { %v491_v33 = vpop.xlane.xlu1 %490 }
 0x2a5   :  { %v535_v35 = vsub.f32 %v1811_v11, %v491_v33 }
 0x2a6   :  { %v488_v36 = vpop.xlane.xlu0 %487 }
 0x2a7   :  { %v552_v38 = vmul.f32 1.442695, %v535_v35  ;;  %v534_v60 = vsub.f32 %v1816_v14, %v488_v36 }
 0x2a9   :  { %1505 = vpow2.f32 %v552_v38  ;;  %v550_v39 = vmul.f32 1.442695, %v534_v60 }
 0x2aa   :  { %v500_v40 = vpop.xlane.xlu1 %499  ;;  %v494_v43 = vpop.xlane.xlu0 %493 }
 0x2ab   :  { %1507 = vpow2.f32 %v550_v39  ;;  %v538_v46 = vsub.f32 %v1824_v22, %v500_v40  ;;  %v536_v48 = vsub.f32 %v1821_v19, %v494_v43 }
 0x2ad   :  { %v554_v24 = vmul.f32 1.442695, %v536_v48  ;;  %v558_v49 = vmul.f32 1.442695, %v538_v46 }
 0x2ae   :  { %v506_v50 = vpop.xlane.xlu1 %505  ;;  %v497_v28 = vpop.xlane.xlu0 %496 }
 0x2af   :  { %v540_v52 = vsub.f32 %v1834_v34, %v506_v50  ;;  %v537_v11 = vsub.f32 %v1827_v25, %v497_v28  ;;  %1509 = vpow2.f32 %v554_v24 }
 0x2b0   :  { %1511 = vpow2.f32 %v558_v49 }
 0x2b1   :  { %v556_v54 = vmul.f32 1.442695, %v537_v11  ;;  %v562_v14 = vmul.f32 1.442695, %v540_v52 }
 0x2b2   :  { %v512_v57 = vpop.xlane.xlu1 %511  ;;  %v503_v61 = vpop.xlane.xlu0 %502 }
 0x2b3   :  { %v542_v62 = vsub.f32 %v1844_v45, %v512_v57  ;;  %v539_v22 = vsub.f32 %v1841_v42, %v503_v61  ;;  %1513 = vpow2.f32 %v556_v54 }
 0x2b4   :  { %1515 = vpow2.f32 %v562_v14 }
 0x2b5   :  { %v560_v19 = vmul.f32 1.442695, %v539_v22  ;;  %v566_v6 = vmul.f32 1.442695, %v542_v62 }
 0x2b6   :  { %v1902_v63 = vpop.eup %1505  ;;  %v518_v7 = vpop.xlane.xlu1 %517 }
 0x2b7   :  { %v509_v34 = vpop.xlane.xlu0 %508  ;;  %v544_v25 = vsub.f32 %v1854_v56, %v518_v7  ;;  %v585_v12 = vsel %vm485_vm1, %v1902_v63, 0.0  ;;  %1517 = vpow2.f32 %v560_v19 }
 0x2b8   :  { %v541_v9 = vsub.f32 %v1851_v53, %v509_v34  ;;  %v1908_v13 = vpop.eup %1507  ;;  %586 = vadd.xlane.f32.xlu0 %v585_v12  ;;  %1519 = vpow2.f32 %v566_v6 }
 0x2b9   :  { %v582_v45 = vsel %vm485_vm1, %v1908_v13, 0.0  ;;  %v570_v15 = vmul.f32 1.442695, %v544_v25 }
 0x2ba   :  { %v564_v42 = vmul.f32 1.442695, %v541_v9  ;;  %v524_v16 = vpop.xlane.xlu1 %523  ;;  %583 = vadd.xlane.f32.xlu1 %v582_v45 }
 0x2bb   :  { %v515_v20 = vpop.xlane.xlu0 %514  ;;  %v546_v56 = vsub.f32 %v1864_v8, %v524_v16 }
 0x2bc   :  { %v543_v53 = vsub.f32 %v1857_v58, %v515_v20  ;;  %1521 = vpow2.f32 %v564_v42  ;;  %v1914_v23 = vpop.eup %1509 }
 0x2bd   :  { %1523 = vpow2.f32 %v570_v15  ;;  %v574_v31 = vmul.f32 1.442695, %v546_v56  ;;  %v588_v33 = vsel %vm485_vm1, %v1914_v23, 0.0  ;;  %v1918_v36 = vpop.eup %1511 }
 0x2be   :  { %v568_v26 = vmul.f32 1.442695, %v543_v53  ;;  %v530_v59 = vpop.xlane.xlu1 %529  ;;  %589 = vadd.xlane.f32.xlu1 %v588_v33  ;;  %v594_v43 = vsel %vm485_vm1, %v1918_v36, 0.0 }
 0x2bf   :  { %v521_v35 = vpop.xlane.xlu0 %520  ;;  %v548_v38 = vsub.f32 %v1874_v18, %v530_v59 }
 0x2c0   :  { %v545_v8 = vsub.f32 %v1871_v17, %v521_v35  ;;  %1525 = vpow2.f32 %v568_v26  ;;  %v1922_v58 = vpop.eup %1513 }
 0x2c1   :  { %1527 = vpow2.f32 %v574_v31  ;;  %v578_v39 = vmul.f32 1.442695, %v548_v38  ;;  %v591_v46 = vsel %vm485_vm1, %v1922_v58, 0.0  ;;  %v1928_v24 = vpop.eup %1515 }
 0x2c2   :  { %v572_v60 = vmul.f32 1.442695, %v545_v8  ;;  %v665_v40 = vpop.permute.xlu1 %664  ;;  %595 = vadd.xlane.f32.xlu1 %v594_v43  ;;  %592 = vadd.xlane.f32.xlu0 %v591_v46  ;;  %v600_v50 = vsel %vm485_vm1, %v1928_v24, 0.0 }
 0x2c3   :  { %v527_v48 = vpop.xlane.xlu0 %526  ;;  %1423 = vmatprep.subr.mxu0 %v665_v40 }
 0x2c4   :  { %v547_v17 = vsub.f32 %v1881_v27, %v527_v48  ;;  %1529 = vpow2.f32 %v572_v60  ;;  %v1931_v18 = vpop.eup %1517  ;;  %1424 = vmatpush3.msra.mxu0 %v665_v40 }
 0x2c5   :  { %1531 = vpow2.f32 %v578_v39  ;;  %v597_v28 = vsel %vm485_vm1, %v1931_v18, 0.0  ;;  %v1937_v11 = vpop.eup %1519 }
 0x2c6   :  { %v576_v49 = vmul.f32 1.442695, %v547_v17  ;;  %601 = vadd.xlane.f32.xlu1 %v600_v50  ;;  %598 = vadd.xlane.f32.xlu0 %v597_v28  ;;  %v606_v57 = vsel %vm485_vm1, %v1937_v11, 0.0 }
 0x2c7   :  { %v533_v52 = vpop.xlane.xlu0 %532 }
 0x2c8   :  { %1533 = vpow2.f32 %v576_v49  ;;  %v549_v27 = vsub.f32 %v1886_v32, %v533_v52 }
 0x2c9   :  { %v1940_v54 = vpop.eup %1521 }
 0x2ca   :  { %v580_v14 = vmul.f32 1.442695, %v549_v27  ;;  %v603_v61 = vsel %vm485_vm1, %v1940_v54, 0.0  ;;  %v1946_v22 = vpop.eup %1523  ;;  %607 = vadd.xlane.f32.xlu1 %v606_v57 }
 0x2cb   :  { %v663_v62 = vpop.permute.xlu0 %662  ;;  %604 = vadd.xlane.f32.xlu0 %v603_v61  ;;  %v612_v32 = vsel %vm485_vm1, %v1946_v22, 0.0 }
 0x2cc   :  { %1535 = vpow2.f32 %v580_v14  ;;  %1425 = vmatprep.subr.mxu0 %v663_v62 }
 0x2cd   :  { %v1948_v19 = vpop.eup %1525  ;;  %1426 = vmatpush3.msra.mxu0 %v663_v62 }
 0x2ce   :  { %v609_v6 = vsel %vm485_vm1, %v1948_v19, 0.0  ;;  %v1954_v7 = vpop.eup %1527  ;;  %613 = vadd.xlane.f32.xlu1 %v612_v32 }
 0x2cf   :  { %610 = vadd.xlane.f32.xlu0 %v609_v6  ;;  %v618_v25 = vsel %vm485_vm1, %v1954_v7, 0.0 }
 0x2d1   :  { %v1956_v34 = vpop.eup %1529 }
 0x2d2   :  { %v615_v9 = vsel %vm485_vm1, %v1956_v34, 0.0  ;;  %v1962_v12 = vpop.eup %1531  ;;  %619 = vadd.xlane.f32.xlu1 %v618_v25 }
 0x2d3   :  { %616 = vadd.xlane.f32.xlu0 %v615_v9  ;;  %v624_v15 = vsel %vm485_vm1, %v1962_v12, 0.0 }
 0x2d5   :  { %v1964_v42 = vpop.eup %1533 }
 0x2d6   :  { %v621_v45 = vsel %vm485_vm1, %v1964_v42, 0.0  ;;  %625 = vadd.xlane.f32.xlu1 %v624_v15 }
 0x2d7   :  { %622 = vadd.xlane.f32.xlu0 %v621_v45 }
 0x2d9   :  { %v1970_v16 = vpop.eup %1535 }
 0x2da   :  { %v627_v20 = vsel %vm485_vm1, %v1970_v16, 0.0 }
 0x2db   :  { %628 = vadd.xlane.f32.xlu0 %v627_v20 }
 0x2e7   :  { %921 = vrot.lane.b32.xlu1 %v1663_v0, %s1626_s10 }
 0x2eb   :  { %917 = vrot.lane.b32.xlu1 %v1677_v3, %s1626_s10 }
 0x2ef   :  { %915 = vrot.lane.b32.xlu1 %v1686_v4, %s1626_s10 }
 0x2f1   :  { %919 = vrot.lane.b32.xlu0 %v1668_v1, %s1626_s10 }
 0x341   :  { %v587_v56 = vpop.xlane.xlu0 %586 }
 0x342   :  { %1537 = vrcp.f32 %v587_v56 }
 0x343   :  { %v584_v53 = vpop.xlane.xlu1 %583 }
 0x344   :  { %1539 = vrcp.f32 %v584_v53 }
 0x347   :  { %v590_v26 = vpop.xlane.xlu1 %589 }
 0x348   :  { %1541 = vrcp.f32 %v590_v26 }
 0x34b   :  { %v596_v31 = vpop.xlane.xlu1 %595  ;;  %v593_v59 = vpop.xlane.xlu0 %592 }
 0x34c   :  { %1543 = vrcp.f32 %v596_v31 }
 0x34d   :  { %1545 = vrcp.f32 %v593_v59 }
 0x34f   :  { %v1538_v0 = vpop.eup %1537  ;;  %v602_v33 = vpop.xlane.xlu1 %601 }
 0x350   :  { %v599_v35 = vpop.xlane.xlu0 %598  ;;  %1547 = vrcp.f32 %v602_v33  ;;  %v633_v1 = vmul.f32 %v1538_v0, %v1902_v63 }
 0x351   :  { %v1540_v3 = vpop.eup %1539  ;;  %1549 = vrcp.f32 %v599_v35 }
 0x352   :  { %v631_v4 = vmul.f32 %v1540_v3, %v1908_v13 }
 0x353   :  { %v608_v38 = vpop.xlane.xlu1 %607 }
 0x354   :  { %v605_v8 = vpop.xlane.xlu0 %604  ;;  %1427 = vmatprep.mubr.msk.f32.mxu0 %vm485_vm1, %v631_v4  ;;  %1551 = vrcp.f32 %v608_v38 }
 0x355   :  { %1428 = vmatmul.mubr.msk.f32.vlgmr.msra.gmra.mxu0 %vm485_vm1, %v633_v1  ;;  %v1542_v60 = vpop.eup %1541  ;;  %1553 = vrcp.f32 %v605_v8 }
 0x356   :  { %v635_v39 = vmul.f32 %v1542_v60, %v1914_v23 }
 0x357   :  { %v614_v40 = vpop.xlane.xlu1 %613 }
 0x358   :  { %v611_v43 = vpop.xlane.xlu0 %610  ;;  %1555 = vrcp.f32 %v614_v40  ;;  %1430 = vmatprep.mubr.msk.f32.mxu0 %vm485_vm1, %v635_v39 }
 0x359   :  { %v1544_v46 = vpop.eup %1543  ;;  %1557 = vrcp.f32 %v611_v43 }
 0x35a   :  { %v1546_v13 = vpop.eup %1545  ;;  %v639_v63 = vmul.f32 %v1544_v46, %v1918_v36 }
 0x35b   :  { %v620_v48 = vpop.xlane.xlu1 %619  ;;  %v637_v49 = vmul.f32 %v1546_v13, %v1922_v58 }
 0x35c   :  { %v617_v17 = vpop.xlane.xlu0 %616  ;;  %1559 = vrcp.f32 %v620_v48 }
 0x35d   :  { %v1548_v50 = vpop.eup %1547  ;;  %1561 = vrcp.f32 %v617_v17  ;;  %1431 = vmatmul.mubr.msk.f32.gmra.mxu0 %vm485_vm1, %v637_v49 }
 0x35e   :  { %v1550_v23 = vpop.eup %1549  ;;  %1433 = vmatprep.mubr.msk.f32.mxu0 %vm485_vm1, %v639_v63  ;;  %v643_v28 = vmul.f32 %v1548_v50, %v1928_v24 }
 0x35f   :  { %v626_v52 = vpop.xlane.xlu1 %625  ;;  %v641_v14 = vmul.f32 %v1550_v23, %v1931_v18 }
 0x360   :  { %v623_v27 = vpop.xlane.xlu0 %622  ;;  %1563 = vrcp.f32 %v626_v52 }
 0x361   :  { %v1552_v36 = vpop.eup %1551  ;;  %1565 = vrcp.f32 %v623_v27  ;;  %1434 = vmatmul.mubr.msk.f32.gmra.mxu0 %vm485_vm1, %v641_v14 }
 0x362   :  { %v1554_v58 = vpop.eup %1553  ;;  %1436 = vmatprep.mubr.msk.f32.mxu0 %vm485_vm1, %v643_v28  ;;  %v647_v57 = vmul.f32 %v1552_v36, %v1937_v11 }
 0x363   :  { %v645_v62 = vmul.f32 %v1554_v58, %v1940_v54 }
 0x364   :  { %v629_v61 = vpop.xlane.xlu0 %628 }
 0x365   :  { %1567 = vrcp.f32 %v629_v61  ;;  %v1556_v32 = vpop.eup %1555  ;;  %1437 = vmatmul.mubr.msk.f32.gmra.mxu0 %vm485_vm1, %v645_v62 }
 0x366   :  { %v1558_v24 = vpop.eup %1557  ;;  %1439 = vmatprep.mubr.msk.f32.mxu0 %vm485_vm1, %v647_v57  ;;  %v651_v18 = vmul.f32 %v1556_v32, %v1946_v22 }
 0x367   :  { %v649_v6 = vmul.f32 %v1558_v24, %v1948_v19 }
 0x369   :  { %v1560_v25 = vpop.eup %1559  ;;  %1440 = vmatmul.mubr.msk.f32.gmra.mxu0 %vm485_vm1, %v649_v6 }
 0x36a   :  { %v1562_v9 = vpop.eup %1561  ;;  %1442 = vmatprep.mubr.msk.f32.mxu0 %vm485_vm1, %v651_v18  ;;  %v655_v11 = vmul.f32 %v1560_v25, %v1954_v7  ;;  %v922_v7 = vpop.permute.xlu1 %921 }
 0x36b   :  { %v653_v54 = vmul.f32 %v1562_v9, %v1956_v34  ;;  %1451 = vmatprep.subr.mxu1 %v922_v7  ;;  %v920_v34 = vpop.permute.xlu0 %919 }
 0x36c   :  { %1452 = vmatpush3.msra.mxu1 %v922_v7 }
 0x36d   :  { %v1564_v45 = vpop.eup %1563  ;;  %1443 = vmatmul.mubr.msk.f32.gmra.mxu0 %vm485_vm1, %v653_v54  ;;  %1453 = vmatprep.subr.mxu1 %v920_v34 }
 0x36e   :  { %v1566_v15 = vpop.eup %1565  ;;  %1445 = vmatprep.mubr.msk.f32.mxu0 %vm485_vm1, %v655_v11  ;;  %v659_v22 = vmul.f32 %v1564_v45, %v1962_v12  ;;  %1454 = vmatpush3.msra.mxu1 %v920_v34  ;;  %v918_v53 = vpop.permute.xlu1 %917 }
 0x36f   :  { %v657_v19 = vmul.f32 %v1566_v15, %v1964_v42  ;;  %1455 = vmatprep.subr.mxu1 %v918_v53 }
 0x370   :  { %1456 = vmatpush3.msra.mxu1 %v918_v53 }
 0x371   :  { %1446 = vmatmul.mubr.msk.f32.gmra.mxu0 %vm485_vm1, %v657_v19 }
 0x372   :  { %v1568_v20 = vpop.eup %1567  ;;  %1448 = vmatprep.mubr.msk.f32.mxu0 %vm485_vm1, %v659_v22  ;;  %v916_v12 = vpop.permute.xlu1 %915 }
 0x373   :  { %v661_v56 = vmul.f32 %v1568_v20, %v1970_v16  ;;  %1457 = vmatprep.subr.mxu1 %v916_v12 }
 0x374   :  { %1458 = vmatpush3.msra.mxu1 %v916_v12 }
 0x375   :  { %1449 = vmatmul.mubr.msk.f32.gmra.mxu0 %vm485_vm1, %v661_v56 }
 0x415   :  { %v1429_v42 = vpop.f32.mrf.mxu0 }
 0x416   :  { %v862_v60 = vmul.f32 %v1429_v42, %v1720_v29 }
 0x417   :  { %v782_v26 = vpop.f32.mrf.mxu0 }
 0x418   :  { %v861_v38 = vmul.f32 %v782_v26, %v1720_v29  ;;  %v892_v29 = vsel %vm54_vm0, %v862_v60, 0.0 }
 0x41d   :  { %v1432_v31 = vpop.f32.mrf.mxu0 }
 0x41e   :  { %v864_v4 = vmul.f32 %v1432_v31, %v1723_v30 }
 0x41f   :  { %v792_v59 = vpop.f32.mrf.mxu0 }
 0x420   :  { %v863_v3 = vmul.f32 %v792_v59, %v1723_v30  ;;  %v893_v13 = vsel %vm54_vm0, %v864_v4, 0.0  ;;  %v877_v30 = vsel %vm54_vm0, %v861_v38, 0.0  ;;  %v53_v59 = vld [vmem:[%s2124_s3 + $0x18] sm:$0xff] }
 0x421   :  { %v1435_v0 = vpop.f32.mrf.mxu0  ;;  %v894_v52 = vadd.f32 %v893_v13, %v892_v29  ;;  %v49_v29 = vld [vmem:[%s2123_s2 + $0x38] sm:$0xff] }
 0x422   :  { %v866_v39 = vmul.f32 %v1435_v0, %v1744_v37  ;;  %v878_v43 = vsel %vm54_vm0, %v863_v3, 0.0  ;;  %v910_v0 = vrot.slane %v53_v59, %v1708_v21  ;;  %1473 = vmatprep.subr.mxu1 %v49_v29 }
 0x423   :  { %v802_v16 = vpop.f32.mrf.mxu0  ;;  %v879_v50 = vadd.f32 %v878_v43, %v877_v30  ;;  %v39_v30 = vld [vmem:[%s2122_s1 + $0x28] sm:$0xff] }
 0x424   :  { %v865_v8 = vmul.f32 %v802_v16, %v1744_v37  ;;  %v895_v37 = vsel %vm54_vm0, %v866_v39, 0.0 }
 0x425   :  { %v1438_v33 = vpop.f32.mrf.mxu0  ;;  %v896_v61 = vadd.f32 %v895_v37, %v894_v52  ;;  %v47_v37 = vld [vmem:[%s2123_s2 + $0x28] sm:$0xff] }
 0x426   :  { %v868_v63 = vmul.f32 %v1438_v33, %v1756_v41  ;;  %v880_v17 = vsel %vm54_vm0, %v865_v8, 0.0  ;;  %v1039_v8 = vsub.s32 1, %v1696_v10 }
 0x427   :  { %v812_v35 = vpop.f32.mrf.mxu0  ;;  %v881_v14 = vadd.f32 %v880_v17, %v879_v50  ;;  %v37_v17 = vld [vmem:[%s2122_s1 + $0x18] sm:$0xff]  ;;  %v48_v50 = vld [vmem:[%s2123_s2 + $0x30] sm:$0xff] }
 0x428   :  { %v867_v46 = vmul.f32 %v812_v35, %v1756_v41  ;;  %v897_v36 = vsel %vm54_vm0, %v868_v63, 0.0  ;;  %v2057_v60 = vrot.slane %v53_v59, %v1039_v8 }
 0x429   :  { %v1441_v1 = vpop.f32.mrf.mxu0  ;;  %v898_v6 = vadd.f32 %v897_v36, %v896_v61 }
 0x42a   :  { %v870_v23 = vmul.f32 %v1441_v1, %v1765_v44  ;;  %v882_v27 = vsel %vm54_vm0, %v867_v46, 0.0 }
 0x42b   :  { %v822_v40 = vpop.f32.mrf.mxu0  ;;  %v883_v32 = vadd.f32 %v882_v27, %v881_v14 }
 0x42c   :  { %v869_v49 = vmul.f32 %v822_v40, %v1765_v44  ;;  %v899_v24 = vsel %vm54_vm0, %v870_v23, 0.0  ;;  %v46_v23 = vld [vmem:[%s2123_s2 + $0x20] sm:$0xff] }
 0x42d   :  { %v1444_v48 = vpop.f32.mrf.mxu0 }
 0x42e   :  { %v872_v58 = vmul.f32 %v1444_v48, %v1775_v47  ;;  %v884_v62 = vsel %vm54_vm0, %v869_v49, 0.0  ;;  %v35_v49 = vld [vmem:[%s2122_s1 + $0x8] sm:$0xff] }
 0x42f   :  { %v832_v28 = vpop.f32.mrf.mxu0  ;;  %v885_v11 = vadd.f32 %v884_v62, %v883_v32 }
 0x430   :  { %v871_v41 = vmul.f32 %v832_v28, %v1775_v47  ;;  %v901_v54 = vsel %vm54_vm0, %v872_v58, 0.0  ;;  %v900_v47 = vadd.f32 %v899_v24, %v898_v6 }
 0x431   :  { %v1447_v57 = vpop.f32.mrf.mxu0 }
 0x432   :  { %v874_v44 = vmul.f32 %v1447_v57, %v1784_v51  ;;  %v886_v25 = vsel %vm54_vm0, %v871_v41, 0.0  ;;  %v902_v7 = vadd.f32 %v901_v54, %v900_v47  ;;  %v42_v54 = vld [vmem:[%s2123_s2] sm:$0xff] }
 0x433   :  { %v842_v18 = vpop.f32.mrf.mxu0  ;;  %v887_v19 = vadd.f32 %v886_v25, %v885_v11  ;;  %v45_v25 = vld [vmem:[%s2123_s2 + $0x18] sm:$0xff]  ;;  %v43_v11 = vld [vmem:[%s2123_s2 + $0x8] sm:$0xff] }
 0x434   :  { %v873_v9 = vmul.f32 %v842_v18, %v1784_v51  ;;  %v903_v20 = vsel %vm54_vm0, %v874_v44, 0.0 }
 0x435   :  { %v1450_v45 = vpop.f32.mrf.mxu0  ;;  %v904_v51 = vadd.f32 %v903_v20, %v902_v7 }
 0x436   :  { %v888_v15 = vsel %vm54_vm0, %v873_v9, 0.0  ;;  %v876_v22 = vmul.f32 %v1450_v45, %v1795_v55  ;;  %v44_v9 = vld [vmem:[%s2123_s2 + $0x10] sm:$0xff]  ;;  %s1628_s2 = smov [#allocation5]  }
 0x437   :  { %v852_v56 = vpop.f32.mrf.mxu0  ;;  %v889_v53 = vadd.f32 %v888_v15, %v887_v19 }
 0x438   :  { %v875_v34 = vmul.f32 %v852_v56, %v1795_v55  ;;  %v905_v12 = vsel %vm54_vm0, %v876_v22, 0.0 }
 0x439   :  { %v906_v31 = vadd.f32 %v905_v12, %v904_v51 }
 0x43a   :  { %v890_v42 = vsel %vm54_vm0, %v875_v34, 0.0 }
 0x43b   :  { %v891_v26 = vadd.f32 %v890_v42, %v889_v53 }
 0x43d   :  { %1459 = vmatprep.mubr.msk.f32.mxu1 %vm54_vm0, %v891_v26 }
 0x43e   :  { %1460 = vmatmul.mubr.msk.f32.vlgmr.msra.gmra.mxu1 %vm54_vm0, %v906_v31 }
 0x43f   :  { %1474 = vmatpush3.msra.mxu1 %v49_v29 }
 0x440   :  { %1475 = vmatprep.subr.mxu1 %v48_v50 }
 0x441   :  { %1476 = vmatpush3.msra.mxu1 %v48_v50 }
 0x442   :  { %1477 = vmatprep.subr.mxu1 %v47_v37 }
 0x443   :  { %1478 = vmatpush3.msra.mxu1 %v47_v37 }
 0x444   :  { %1479 = vmatprep.subr.mxu1 %v46_v23 }
 0x445   :  { %1480 = vmatpush3.msra.mxu1 %v46_v23 }
 0x446   :  { %1481 = vmatprep.subr.mxu1 %v45_v25 }
 0x447   :  { %1482 = vmatpush3.msra.mxu1 %v45_v25 }
 0x448   :  { %1483 = vmatprep.subr.mxu1 %v44_v9 }
 0x449   :  { %1484 = vmatpush3.msra.mxu1 %v44_v9 }
 0x44a   :  { %1485 = vmatprep.subr.mxu1 %v43_v11 }
 0x44b   :  { %1486 = vmatpush3.msra.mxu1 %v43_v11 }
 0x44c   :  { %1487 = vmatprep.subr.mxu1 %v42_v54 }
 0x44d   :  { %1488 = vmatpush3.msra.mxu1 %v42_v54 }
 0x4fe   :  { %v1461_v16 = vpop.f32.mrf.mxu1 }
 0x4ff   :  { %v1005_v55 = vadd.f32 %v1461_v16, %v910_v0 }
 0x500   :  { %v999_v33 = vpop.f32.mrf.mxu1 }
 0x501   :  { %v1000_v35 = vadd.f32 %v999_v33, %v910_v0  ;;  %v1009_v3 = vadd.f32 %v1005_v55, %v1690_v5  ;;  %v41_v5 = vld [vmem:[%s2122_s1 + $0x38] sm:$0xff] }
 0x502   :  { %1462 = vmatprep.subr.mxu0 %v41_v5 }
 0x503   :  { %v1013_v4 = vsel %vm54_vm0, %v1009_v3, 0.0  ;;  %v1008_v1 = vadd.f32 %v1000_v35, %v1671_v2  ;;  %1463 = vmatpush3.msra.mxu0 %v41_v5 }
 0x504   :  { %1014 = vadd.xlane.f32.xlu1 %v1013_v4  ;;  %1464 = vmatprep.subr.mxu0 %v39_v30 }
 0x505   :  { %v1010_v38 = vsel %vm54_vm0, %v1008_v1, 0.0  ;;  %1465 = vmatpush3.msra.mxu0 %v39_v30 }
 0x506   :  { %1011 = vadd.xlane.f32.xlu0 %v1010_v38  ;;  %1466 = vmatprep.subr.mxu0 %v37_v17 }
 0x507   :  { %1467 = vmatpush3.msra.mxu0 %v37_v17 }
 0x508   :  { %1468 = vmatprep.subr.mxu0 %v35_v49 }
 0x509   :  { %1469 = vmatpush3.msra.mxu0 %v35_v49 }
 0x515   :  { %1044 = vrot.lane.b32.xlu1 %v2057_v60, %s1625_s9 }
 0x519   :  { %1136 = vrot.lane.b32.xlu1 %v910_v0, %s1626_s10 }
 0x58d   :  { %v1015_v2 = vpop.xlane.xlu1 %1014 }
 0x58e   :  { %v1018_v21 = vmul.f32 0.03125, %v1015_v2 }
 0x58f   :  { %v1012_v39 = vpop.xlane.xlu0 %1011 }
 0x590   :  { %v1017_v40 = vmul.f32 0.03125, %v1012_v39  ;;  %v1020_v43 = vsub.f32 %v1009_v3, %v1018_v21 }
 0x591   :  { %v1045_v61 = vpop.permute.xlu1 %1044 }
 0x592   :  { %v1019_v46 = vsub.f32 %v1008_v1, %v1017_v40  ;;  %v1022_v63 = vmul.f32 %v1020_v43, %v1020_v43 }
 0x594   :  { %v1021_v10 = vmul.f32 %v1019_v46, %v1019_v46  ;;  %v1026_v48 = vsel %vm54_vm0, %v1022_v63, 0.0 }
 0x595   :  { %v1137_v7 = vpop.permute.xlu1 %1136 }
 0x596   :  { %v1023_v13 = vsel %vm54_vm0, %v1021_v10, 0.0 }
 0x597   :  { %1024 = vadd.xlane.f32.xlu0 %v1023_v13 }
 0x59b   :  { %1027 = vadd.xlane.f32.xlu0 %v1026_v48 }
 0x5b1   :  { %1050 = vrot.lane.b32.xlu0 %v910_v0, %s1625_s9 }
 0x620   :  { %v1025_v28 = vpop.xlane.xlu0 %1024 }
 0x621   :  { %v1029_v52 = vmul.f32 0.03125, %v1025_v28 }
 0x623   :  { %v1031_v27 = vadd.f32 1e-05, %v1029_v52 }
 0x624   :  { %v1028_v41 = vpop.xlane.xlu0 %1027 }
 0x625   :  { %1569 = vrsqrt.f32 %v1031_v27  ;;  %v1030_v14 = vmul.f32 0.03125, %v1028_v41 }
 0x627   :  { %v1032_v36 = vadd.f32 1e-05, %v1030_v14 }
 0x628   :  { %v1051_v45 = vpop.permute.xlu0 %1050 }
 0x629   :  { %1571 = vrsqrt.f32 %v1032_v36 }
 0x632   :  { %v1570_v58 = vpop.eup %1569 }
 0x633   :  { %v1035_v57 = vmul.f32 %v1570_v58, %v1019_v46 }
 0x635   :  { %v1041_v62 = vmul.f32 %v2057_v60, %v1035_v57 }
 0x636   :  { %v1572_v32 = vpop.eup %1571 }
 0x637   :  { %v1036_v24 = vmul.f32 %v1572_v32, %v1020_v43  ;;  %v1047_v44 = vadd.f32 %v1045_v61, %v1041_v62 }
 0x639   :  { %v1042_v18 = vmul.f32 %v2057_v60, %v1036_v24  ;;  %1470 = vmatprep.mubr.msk.f32.mxu0 %vm54_vm0, %v1047_v44 }
 0x63b   :  { %v1048_v6 = vadd.f32 %v1045_v61, %v1042_v18 }
 0x63d   :  { %1471 = vmatmul.mubr.msk.f32.vlgmr.msra.gmra.mxu0 %vm54_vm0, %v1048_v6 }
 0x6fd   :  { %v1472_v47 = vpop.f32.mrf.mxu0 }
 0x6fe   :  { %v1131_v15 = vadd.f32 %v1472_v47, %v1051_v45 }
 0x6ff   :  { %v1125_v22 = vpop.f32.mrf.mxu0 }
 0x700   :  { %v1126_v19 = vadd.f32 %v1125_v22, %v1051_v45  ;;  %v1135_v56 = vmax.f32 %v1131_v15, 0.0 }
 0x702   :  { %v1134_v20 = vmax.f32 %v1126_v19, 0.0 }
 0x704   :  { %1489 = vmatprep.mubr.msk.f32.mxu1 %vm1139_vm2, %v1134_v20 }
 0x705   :  { %1490 = vmatmul.mubr.msk.f32.vlgmr.msra.gmra.mxu1 %vm1139_vm2, %v1135_v56 }
 0x7c5   :  { %v1491_v34 = vpop.f32.mrf.mxu1 }
 0x7c6   :  { %v1218_v53 = vadd.f32 %v1491_v34, %v1137_v7 }
 0x7c7   :  { %v1212_v12 = vpop.f32.mrf.mxu1 }
 0x7c8   :  { %v1213_v51 = vadd.f32 %v1212_v12, %v1137_v7  ;;  %v1222_v42 = vadd.f32 %v1218_v53, %v1048_v6 }
 0x7ca   :  { %v1226_v26 = vsel %vm54_vm0, %v1222_v42, 0.0  ;;  %v1221_v31 = vadd.f32 %v1213_v51, %v1047_v44 }
 0x7cb   :  { %1227 = vadd.xlane.f32.xlu0 %v1226_v26 }
 0x7cc   :  { %v1223_v59 = vsel %vm54_vm0, %v1221_v31, 0.0 }
 0x7cd   :  { %1224 = vadd.xlane.f32.xlu1 %v1223_v59 }
 0x854   :  { %v1228_v0 = vpop.xlane.xlu0 %1227 }
 0x855   :  { %v1230_v16 = vmul.f32 0.03125, %v1228_v0 }
 0x856   :  { %v1225_v55 = vpop.xlane.xlu1 %1224 }
 0x857   :  { %v1232_v33 = vsub.f32 %v1222_v42, %v1230_v16  ;;  %v1229_v35 = vmul.f32 0.03125, %v1225_v55 }
 0x859   :  { %v1231_v3 = vsub.f32 %v1221_v31, %v1229_v35  ;;  %v1234_v4 = vmul.f32 %v1232_v33, %v1232_v33 }
 0x85b   :  { %v1238_v1 = vsel %vm54_vm0, %v1234_v4, 0.0  ;;  %v1233_v38 = vmul.f32 %v1231_v3, %v1231_v3 }
 0x85c   :  { %1239 = vadd.xlane.f32.xlu1 %v1238_v1 }
 0x85d   :  { %v1235_v8 = vsel %vm54_vm0, %v1233_v38, 0.0 }
 0x85e   :  { %1236 = vadd.xlane.f32.xlu0 %v1235_v8 }
 0x86d   :  { %1254 = vrot.lane.b32.xlu1 %v2057_v60, %s1626_s10  ;;  %s1266_s10 = sshll.u32 %s1628_s2, 4  ;;  %s1267_s10 = int_to_ptr.vmem [resolvable:$true] %s1266_s10 }
 0x86e   :  { %p1602_p6 = scmp.lt.s32.totalorder %s1267_s10, %s1267_s10 }
 0x874   :  { %1249 = vrot.lane.b32.xlu0 %v2057_v60, %s1627_s11  ;;  %s1597_s11 = scalar_lea.vmem %s1267_s10, 256 }
 0x875   :  { %p1598_p5 = scmp.ne.s32.totalorder %s1267_s10, %s1597_s11  ;;  %p1603_p7 = scmp.lt.s32.totalorder %s1597_s11, %s1597_s11 }
 0x877   :  { %p1604_p8 = por %p1603_p7, %p1602_p6 }
 0x879   :  { %p1605_p9 = pnand %p1604_p8, %p1598_p5 }
 0x8e5   :  { %v1240_v5 = vpop.xlane.xlu1 %1239 }
 0x8e6   :  { %v1242_v2 = vmul.f32 0.03125, %v1240_v5 }
 0x8e7   :  { %v1237_v21 = vpop.xlane.xlu0 %1236 }
 0x8e8   :  { %v1244_v39 = vadd.f32 1e-05, %v1242_v2  ;;  %v1241_v40 = vmul.f32 0.03125, %v1237_v21 }
 0x8e9   :  { %v1255_v48 = vpop.permute.xlu1 %1254 }
 0x8ea   :  { %1573 = vrsqrt.f32 %v1244_v39  ;;  %v1243_v43 = vadd.f32 1e-05, %v1241_v40 }
 0x8eb   :  { %v1250_v10 = vpop.permute.xlu0 %1249 }
 0x8ec   :  { %1575 = vrsqrt.f32 %v1243_v43 }
 0x8f7   :  { %v1574_v46 = vpop.eup %1573 }
 0x8f8   :  { %v1248_v13 = vmul.f32 %v1574_v46, %v1232_v33 }
 0x8f9   :  { %v1576_v63 = vpop.eup %1575 }
 0x8fa   :  { %v1247_v30 = vmul.f32 %v1576_v63, %v1231_v3  ;;  %v1253_v17 = vmul.f32 %v1250_v10, %v1248_v13 }
 0x8fc   :  { %v1252_v49 = vmul.f32 %v1250_v10, %v1247_v30  ;;  %v1258_v29 = vadd.f32 %v1255_v48, %v1253_v17 }
 0x8fe   :  { %v1257_v60 = vadd.f32 %v1255_v48, %v1252_v49  ;;  %1260 = vst.msk [vmem:[#allocation5 + $0x8] sm:$0xff] %vm54_vm0, %v1258_v29 }
 0x900   :  { %1259 = vst.msk [vmem:[#allocation5] sm:$0xff] %vm54_vm0, %v1257_v60 }
 0x901   :  { %1608 = shalt.err (!%p1605_p9)
}
 0x902   :  { %1272 = dma.vmem_to_hbm [thread:$0]  %s1267_s10, 256, %s2125_s4, [#allocation4], %s1622_s18, %s1622_s18, %s1623_s19  }
 0x903   :  { %1619 = dma.done.wait [#allocation4], 256  }
 0x904   :  { %1620 = vsyncadd [#allocation4], 4294967040 }
 0x905   :  { %1276 = vsyncpa [#allocation3], 1 }
 0x906   :  { %1277 = vsyncpa [#allocation4], 1 }

</bundles_post_ra>
